<compile_context>
chip_gen: v7x
topology: tpu7x:2x2x1
jax: 0.10.0
libtpu: 0.0.40
codegen_flags: <defaults>
</compile_context>

<pallas_src>
import functools

import jax
import jax.numpy as jnp
from jax import lax
from jax.experimental import pallas as pl
from jax.experimental.pallas import tpu as pltpu

_I32_MAX = 2 ** 31 - 1  # sentinel key for peeled / self entries


def _repulsion_kernel(x_ref, sqn_ref, o_ref, *, n, c, k, tm, h):
    # x_ref:   (1, N, C)  full point cloud for this batch (resident across row tiles)
    # sqn_ref: (1, 1, N)  precomputed per-point squared norms, lane-dense
    # o_ref:   (1, 1, 8, 128) per-(batch, row-tile) partial clamp-sum
    j = pl.program_id(1)
    row0 = pl.multiple_of(j * tm, tm)

    x_all = x_ref[0].astype(jnp.float32)                        # (N, C)
    xq = x_ref[0, pl.ds(row0, tm), :].astype(jnp.float32)       # (TM, C)

    sq_cols = sqn_ref[0].astype(jnp.float32)                    # (1, N)
    sq_rows = jnp.sum(xq * xq, axis=-1, keepdims=True)          # (TM, 1)

    # Pairwise squared distances for this row tile (gram form on the MXU).
    g = lax.dot_general(xq, x_all, (((1,), (1,)), ((), ())),
                        preferred_element_type=jnp.float32)     # (TM, N)
    d = jnp.maximum(sq_rows + sq_cols - 2.0 * g, 0.0)           # (TM, N), >= 0

    # Fused monotone key: f32 bits of d (non-negative -> monotone as int32) with
    # the low bits replaced by the column index so every key in a row is unique.
    # One cross-lane min per peel both ranks the distances and identifies the
    # exact (first-occurrence) element to mask out.
    nbits = max(1, (n - 1).bit_length())
    col = lax.broadcasted_iota(jnp.int32, (tm, n), 1)           # built once per step
    row = lax.broadcasted_iota(jnp.int32, (tm, n), 0) + row0
    d_bits = pltpu.bitcast(d, jnp.int32)
    key = (d_bits & ~((1 << nbits) - 1)) | col
    key = jnp.where(col == row, _I32_MAX, key)                  # exclude self-distance

    picked = None
    for r in range(k - 1):                                      # peel the k-1 nearest
        mkey = jnp.min(key, axis=-1, keepdims=True)             # single XLU reduction
        sel = key == mkey                                       # exactly one per row
        picked = sel if picked is None else jnp.logical_or(picked, sel)
        if r < k - 2:
            key = jnp.where(sel, _I32_MAX, key)

    # Single full-slab reduction for the clamp-sum of this tile.
    contrib = jnp.where(picked, jnp.maximum(h - d, 0.0), 0.0)
    total = jnp.sum(contrib)

    o_ref[...] = jnp.full(o_ref.shape, total, dtype=o_ref.dtype)


def _pick_row_tile(n):
    for t in (128, 64, 32, 16, 8):
        if n % t == 0:
            return t
    return n  # ragged N: fall back to a single row tile


def repulsion_loss(x, k, h=0.0005):
    b, n, c = x.shape
    assert k >= 2 and n >= k, "need at least k points per cloud and k >= 2"
    tm = _pick_row_tile(n)
    nt = n // tm

    xf = x.astype(jnp.float32)
    sqn = jnp.sum(xf * xf, axis=-1)[:, None, :]                 # (B, 1, N) lane-dense norms

    out = pl.pallas_call(
        functools.partial(_repulsion_kernel, n=n, c=c, k=k, tm=tm, h=float(h)),
        out_shape=jax.ShapeDtypeStruct((b, nt, 8, 128), jnp.float32),
        grid_spec=pltpu.PrefetchScalarGridSpec(
            num_scalar_prefetch=0,
            grid=(b, nt),
            in_specs=[
                pl.BlockSpec((1, n, c), lambda i, j: (i, 0, 0)),  # full cloud, per batch
                pl.BlockSpec((1, 1, n), lambda i, j: (i, 0, 0)),  # precomputed col norms
            ],
            out_specs=pl.BlockSpec((1, 1, 8, 128), lambda i, j: (i, j, 0, 0)),
        ),
        compiler_params=pltpu.CompilerParams(
            dimension_semantics=("parallel", "parallel"),
            vmem_limit_bytes=48 * 1024 * 1024,
        ),
    )(xf, sqn)

    total = jnp.sum(out[:, :, 0, 0])
    return total / jnp.float32(b * n * (k - 1))


def repulsion_loss_ref(x, k, h=0.0005):
    # Pure-JAX reference: exact brute-force KNN (sorted squared distances).
    diff = x[:, :, None, :] - x[:, None, :, :]
    d2 = jnp.sum(diff * diff, axis=-1)                          # (B, N, N)
    dist = jnp.sort(d2, axis=-1)[:, :, 1:k]                     # (B, N, k-1) squared
    return jnp.mean(jnp.maximum(-dist + h, 0.0))


if __name__ == "__main__":
    B, N, C = 2, 64, 3
    K = 4          # self.k = num
    H = 0.0005

    key = jax.random.PRNGKey(0)
    # Small-extent point cloud so some neighbor distances fall below sqrt(h).
    x = jax.random.uniform(key, (B, N, C), dtype=jnp.float32) * 0.05

    loss = jax.block_until_ready(repulsion_loss(x, K, H))
    loss_ref = repulsion_loss_ref(x, K, H)
    assert jnp.allclose(loss, loss_ref, rtol=1e-4, atol=1e-7), (loss, loss_ref)

    print("KERNEL_OK")
</pallas_src>

<mosaic_0001>
module attributes {stable_mosaic.version = 11 : i64} {
  func.func @_repulsion_kernel(%arg0: i32, %arg1: i32, %arg2: memref<1x64x3xf32, #tpu.memory_space<vmem>>, %arg3: memref<1x1x64xf32, #tpu.memory_space<vmem>>, %arg4: memref<1x1x8x128xf32, #tpu.memory_space<vmem>>) attributes {dimension_semantics = [#tpu.dimension_semantics<parallel>, #tpu.dimension_semantics<parallel>], iteration_bounds = array<i64: 2, 1>, scalar_prefetch = 0 : i64, scratch_operands = 0 : i64, tpu.core_type = #tpu.core_type<tc>, window_params = [{transform_indices = @transform_0, window_bounds = array<i64: 1, 64, 3>}, {transform_indices = @transform_1, window_bounds = array<i64: 1, 1, 64>}, {transform_indices = @transform_2, window_bounds = array<i64: 1, 1, 8, 128>}]} {
    %c64_i32 = arith.constant 64 : i32
    %0 = arith.muli %arg1, %c64_i32 : i32
    %1 = tpu.assume_multiple %0, 64 : i32
    %c0 = arith.constant 0 : index
    %c0_0 = arith.constant 0 : index
    %c0_1 = arith.constant 0 : index
    %2 = vector.load %arg2[%c0, %c0_0, %c0_1] : memref<1x64x3xf32, #tpu.memory_space<vmem>>, vector<1x64x3xf32>
    %3 = vector.shape_cast %2 : vector<1x64x3xf32> to vector<64x3xf32>
    %c0_2 = arith.constant 0 : index
    %4 = arith.index_cast %1 : i32 to index
    %c0_3 = arith.constant 0 : index
    %5 = vector.load %arg2[%c0_2, %4, %c0_3] : memref<1x64x3xf32, #tpu.memory_space<vmem>>, vector<1x64x3xf32>
    %6 = vector.shape_cast %5 : vector<1x64x3xf32> to vector<64x3xf32>
    %c0_4 = arith.constant 0 : index
    %c0_5 = arith.constant 0 : index
    %c0_6 = arith.constant 0 : index
    %7 = vector.load %arg3[%c0_4, %c0_5, %c0_6] : memref<1x1x64xf32, #tpu.memory_space<vmem>>, vector<1x1x64xf32>
    %8 = vector.shape_cast %7 : vector<1x1x64xf32> to vector<1x64xf32>
    %9 = arith.mulf %6, %6 : vector<64x3xf32>
    %cst = arith.constant dense<0.000000e+00> : vector<64xf32>
    %10 = vector.multi_reduction <add>, %9, %cst [1] : vector<64x3xf32> to vector<64xf32>
    %11 = vector.shape_cast %10 : vector<64xf32> to vector<64x1xf32>
    %cst_7 = arith.constant dense<0.000000e+00> : vector<64x64xf32>
    %12 = tpu.matmul %6, %3, %cst_7 {dimension_numbers = #tpu.dot_dimension_numbers<[1], [1], [0], [0], [0, 0, 1, 0], [], []>} : vector<64x3xf32>, vector<64x3xf32>, vector<64x64xf32> -> vector<64x64xf32>
    %13 = vector.broadcast %11 : vector<64x1xf32> to vector<64x64xf32>
    %14 = vector.broadcast %8 : vector<1x64xf32> to vector<64x64xf32>
    %15 = arith.addf %13, %14 : vector<64x64xf32>
    %cst_8 = arith.constant 2.000000e+00 : f32
    %16 = vector.broadcast %cst_8 : f32 to vector<64x64xf32>
    %17 = arith.mulf %16, %12 : vector<64x64xf32>
    %18 = arith.subf %15, %17 : vector<64x64xf32>
    %cst_9 = arith.constant 0.000000e+00 : f32
    %19 = vector.broadcast %cst_9 : f32 to vector<64x64xf32>
    %20 = arith.maximumf %18, %19 : vector<64x64xf32>
    %21 = tpu.iota {dimensions = array<i32: 1>} : vector<64x64xi32>
    %22 = tpu.iota {dimensions = array<i32: 0>} : vector<64x64xi32>
    %23 = vector.broadcast %1 : i32 to vector<64x64xi32>
    %24 = arith.addi %22, %23 : vector<64x64xi32>
    %25 = tpu.bitcast %20 : vector<64x64xf32> -> vector<64x64xi32>
    %c-64_i32 = arith.constant -64 : i32
    %26 = vector.broadcast %c-64_i32 : i32 to vector<64x64xi32>
    %27 = arith.andi %25, %26 : vector<64x64xi32>
    %28 = arith.ori %27, %21 : vector<64x64xi32>
    %29 = arith.cmpi eq, %21, %24 : vector<64x64xi32>
    %c2147483647_i32 = arith.constant 2147483647 : i32
    %30 = vector.broadcast %c2147483647_i32 : i32 to vector<64x64xi32>
    %31 = arith.select %29, %30, %28 : vector<64x64xi1>, vector<64x64xi32>
    %cst_10 = arith.constant dense<2147483647> : vector<64xi32>
    %32 = vector.multi_reduction <minsi>, %31, %cst_10 [1] : vector<64x64xi32> to vector<64xi32>
    %33 = vector.shape_cast %32 : vector<64xi32> to vector<64x1xi32>
    %34 = vector.broadcast %33 : vector<64x1xi32> to vector<64x64xi32>
    %35 = arith.cmpi eq, %31, %34 : vector<64x64xi32>
    %c2147483647_i32_11 = arith.constant 2147483647 : i32
    %36 = vector.broadcast %c2147483647_i32_11 : i32 to vector<64x64xi32>
    %37 = arith.select %35, %36, %31 : vector<64x64xi1>, vector<64x64xi32>
    %cst_12 = arith.constant dense<2147483647> : vector<64xi32>
    %38 = vector.multi_reduction <minsi>, %37, %cst_12 [1] : vector<64x64xi32> to vector<64xi32>
    %39 = vector.shape_cast %38 : vector<64xi32> to vector<64x1xi32>
    %40 = vector.broadcast %39 : vector<64x1xi32> to vector<64x64xi32>
    %41 = arith.cmpi eq, %37, %40 : vector<64x64xi32>
    %42 = arith.ori %35, %41 : vector<64x64xi1>
    %c2147483647_i32_13 = arith.constant 2147483647 : i32
    %43 = vector.broadcast %c2147483647_i32_13 : i32 to vector<64x64xi32>
    %44 = arith.select %41, %43, %37 : vector<64x64xi1>, vector<64x64xi32>
    %cst_14 = arith.constant dense<2147483647> : vector<64xi32>
    %45 = vector.multi_reduction <minsi>, %44, %cst_14 [1] : vector<64x64xi32> to vector<64xi32>
    %46 = vector.shape_cast %45 : vector<64xi32> to vector<64x1xi32>
    %47 = vector.broadcast %46 : vector<64x1xi32> to vector<64x64xi32>
    %48 = arith.cmpi eq, %44, %47 : vector<64x64xi32>
    %49 = arith.ori %42, %48 : vector<64x64xi1>
    %cst_15 = arith.constant 5.000000e-04 : f32
    %50 = vector.broadcast %cst_15 : f32 to vector<64x64xf32>
    %51 = arith.subf %50, %20 : vector<64x64xf32>
    %cst_16 = arith.constant 0.000000e+00 : f32
    %52 = vector.broadcast %cst_16 : f32 to vector<64x64xf32>
    %53 = arith.maximumf %51, %52 : vector<64x64xf32>
    %cst_17 = arith.constant 0.000000e+00 : f32
    %54 = vector.broadcast %cst_17 : f32 to vector<64x64xf32>
    %55 = arith.select %49, %53, %54 : vector<64x64xi1>, vector<64x64xf32>
    %56 = vector.shape_cast %55 : vector<64x64xf32> to vector<1x64x64xf32>
    %cst_18 = arith.constant dense<0.000000e+00> : vector<1xf32>
    %57 = vector.multi_reduction <add>, %56, %cst_18 [1, 2] : vector<1x64x64xf32> to vector<1xf32>
    %58 = vector.shape_cast %57 : vector<1xf32> to vector<1x1x1xf32>
    %59 = vector.extract %58[0, 0, 0] : f32 from vector<1x1x1xf32>
    %60 = vector.broadcast %59 : f32 to vector<1x1x8x128xf32>
    %c0_19 = arith.constant 0 : index
    %c0_20 = arith.constant 0 : index
    %c0_21 = arith.constant 0 : index
    %c0_22 = arith.constant 0 : index
    %61 = vector.load %arg4[%c0_19, %c0_20, %c0_21, %c0_22] : memref<1x1x8x128xf32, #tpu.memory_space<vmem>>, vector<1x1x8x128xf32>
    tpu.vector_store %arg4[%c0_19, %c0_20, %c0_21, %c0_22], %60 {strides = array<i32>} : memref<1x1x8x128xf32, #tpu.memory_space<vmem>>, vector<1x1x8x128xf32>,
    return
  }
  func.func @transform_0(%arg0: i32, %arg1: i32) -> (i32, i32, i32) {
    %c0_i32 = arith.constant 0 : i32
    %c0_i32_0 = arith.constant 0 : i32
    %c0_i32_1 = arith.constant 0 : i32
    return %arg0, %c0_i32, %c0_i32_0 : i32, i32, i32
  }
  func.func @transform_1(%arg0: i32, %arg1: i32) -> (i32, i32, i32) {
    %c0_i32 = arith.constant 0 : i32
    %c0_i32_0 = arith.constant 0 : i32
    %c0_i32_1 = arith.constant 0 : i32
    return %arg0, %c0_i32, %c0_i32_0 : i32, i32, i32
  }
  func.func @transform_2(%arg0: i32, %arg1: i32) -> (i32, i32, i32, i32) {
    %c0_i32 = arith.constant 0 : i32
    %c0_i32_0 = arith.constant 0 : i32
    %c0_i32_1 = arith.constant 0 : i32
    return %arg0, %arg1, %c0_i32, %c0_i32_0 : i32, i32, i32, i32
  }
}

</mosaic_0001>

<bundles_post_ra>
// kernel: tpu_custom_call.1
= control target key start
LH: loop header
LB: loop body
LE: loop exit
PB: predicated region body
PF: predicated region fallthrough
CT: control target
= control target key end

     0   :  { %7 = vsyncpa [#allocation3], 0  ;;  %s1877_s0 = inlined_call_operand.vmem [shape: f32[2,64,3], index: 0, kind: input, shape index: {}]   ;;  %s1878_s1 = inlined_call_operand.vmem [shape: f32[2,1,64], index: 1, kind: input, shape index: {}]   ;;  %s1879_s2 = inlined_call_operand.hbm [shape: f32[2,1,8,128], index: 2, kind: output, shape index: {}]  }
   0x1   :  { %9 = vsyncpa [#allocation3 + $0x1], 0  ;;  %s1293_s9 = smov 0   ;;  %s1295_s10 = smov 0  }
   0x2   :  { %s1297_s11 = smov 0   ;;  %s1299_s12 = smov 0  }
   0x3   :  { %s1301_s13 = smov 0   ;;  %s1303_s14 = smov 0  }
   0x4 LB: > { %s1034_s15 = sadd.s32 4294967295, %s1275_s14   ;;  %s1035_s16 = sadd.s32 4294967294, %s1275_s14   ;;  %s1275_s14 = sphi %s1303_s14, %s15_s14   ;;  %s1271_s13 = sphi %s1301_s13, %s1947_s13   ;;  %s1267_s12 = sphi %s1299_s12, %s1946_s12   ;;  %s1263_s11 = sphi %s1297_s11, %s1945_s11   ;;  %s1259_s10 = sphi %s1295_s10, %s1944_s10   ;;  %s1255_s9 = sphi %s1293_s9, %s1943_s9  }
   0x5   : > { %s27_s17 = sadd.s32 1, %s1271_s13  ;;  %s88_s18 = sadd.s32 1, %s1263_s11 }
   0x6   : > { %p29_p0 = scmp.ge.s32.totalorder %s27_s17, 2  ;;  %p98_p1 = scmp.ne.s32.totalorder %s1263_s11, %s1259_s10 }
   0x7   : > { %p99_p2 = scmp.eq.s32.totalorder %s1034_s15, 1  ;;  %p104_p3 = scmp.ne.s32.totalorder %s1259_s10, %s1255_s9 }
   0x8   : > { %s1949_s17 = smov (%p29_p0, %s27_s17), 0  ;;  %p105_p5 = scmp.eq.s32.totalorder %s1035_s16, 1 }
   0x9   : > { %p1333_p4 = por %p99_p2, %p98_p1  ;;  %s83_s20 = ssub.s32 %s1271_s13, %s1949_s17 }
   0xa   : > { %p1038_p6 = scmp.ge.s32.totalorder %s1275_s14, 1  ;;  %p86_p7 = scmp.eq.s32.totalorder %s83_s20, 0 }
   0xb   : > { %p1340_p8 = por %p105_p5, %p104_p3  ;;  %p137_p9 = scmp.lt.s32.totalorder %s1275_s14, 3 }
   0xc   : > { %s1346_s22 = scalar_select %p86_p7, %s1263_s11, %s88_s18  }
   0xd   : > { %p138_p10 = pnand %p1038_p6, %p137_p9 }
   0xf   : > { %141 = sbr.rel (%p138_p10) target bundleno = 1415 (0x587), region = 28 }
  0x16   : > { %p162_p11 = scmp.lt.s32.totalorder %s1267_s12, 1  ;;  %vm197_vm0 = vcmask 23552   ;;  %v413_v32 = vlaneseq  ;;  %vm473_vm3 = vcmask 523264   ;;  %s159_s3 = sand.u32 1, %s1259_s10  }
  0x17   : > { %vm1360_vm1 = vmpackc.low %vm197_vm0, %vm197_vm0  ;;  %s1039_s4 = sshll.u32 %s159_s3, 3  ;;  %s1060_s7 = sshll.u32 %s1267_s12, 7 }
  0x18   : > { %s1350_s23 = scalar_select %p162_p11, %s1267_s12, 1  ;;  %v1424_v36 = vshrl.u32 %v413_v32, 7  ;;  %v1426_v41 = vand.u32 127, %v413_v32 }
  0x19   : > { %s161_s5 = scalar_lea.vmem [#allocation2], %s1039_s4  ;;  %s1832_s18 = scalar_lea.hbm %s1879_s2, %s1060_s7 }
  0x1a   : > { %s1063_s24 = sshll.u32 %s1350_s23, 6  ;;  %s169_s30 = scalar_lea.vmem %s1878_s1, %s1350_s23  ;;  %v417_v44 = vadd.s32 8, %v1424_v36  ;;  %vm457_vm4 = vcmp.eq.s32.totalorder %v1426_v41, %v1424_v36 }
  0x1b   : > { %s1356_s27 = scalar_lea.vmem %s1877_s0, %s1063_s24  ;;  %v1058_v34 = vld [vmem:[%s169_s30] ss:$0 sm:$0xff]  ;;  %s955_s6 = sshll.u32 %s161_s5, 4  ;;  %s1827_s6 = int_to_ptr.vmem [resolvable:$true] %s955_s6 }
  0x1c   : > { %v171_v1 = vld [vmem:[%s1356_s27] sm:$0xff]  ;;  %v172_v2 = vld [vmem:[%s1356_s27 + $0x8] sm:$0xff]  ;;  %v173_v3 = vld [vmem:[%s1356_s27 + $0x10] sm:$0xff]  ;;  %vm458_vm2 = vcmp.eq.s32.totalorder %v1426_v41, %v417_v44  ;;  %s941_s20 = scalar_lea.sflag [#allocation3], %s159_s3  ;;  %s1197_s23 = scalar_lea.vmem %s1827_s6, 128 }
  0x1d   : > { %v1108_v4 = vpack.c.bf16 %v172_v2, %v171_v1  ;;  %v174_v5 = vld [vmem:[%s1356_s27 + $0x18] sm:$0xff]  ;;  %v175_v6 = vld [vmem:[%s1356_s27 + $0x20] sm:$0xff]  ;;  %v189_v7 = vmul.f32 %v171_v1, %v171_v1  ;;  %1096 = vmatprep.mubr.msk.f32.mxu0 %vm197_vm0, %v171_v1  ;;  %v191_v8 = vmul.f32 %v173_v3, %v173_v3  ;;  %v190_v12 = vmul.f32 %v172_v2, %v172_v2  ;;  %v176_v14 = vld [vmem:[%s1356_s27 + $0x28] sm:$0xff]  ;;  %p1198_p12 = scmp.ne.s32.totalorder %s1827_s6, %s1197_s23  ;;  %s1277_s12 = smov [#allocation2]  }
  0x1e   : > { %v1114_v9 = vpack.c.bf16 %v174_v5, %v173_v3  ;;  %1102 = vmatprep.mubr.msk.f32.mxu1 %vm197_vm0, %v175_v6  ;;  %v192_v13 = vmul.f32 %v174_v5, %v174_v5  ;;  %v193_v15 = vmul.f32 %v175_v6, %v175_v6  ;;  %v194_v18 = vmul.f32 %v176_v14, %v176_v14  ;;  %v177_v20 = vld [vmem:[%s1356_s27 + $0x30] sm:$0xff]  ;;  %v178_v21 = vld [vmem:[%s1356_s27 + $0x38] sm:$0xff]  ;;  %s1201_s24 = sshll.u32 %s1277_s12, 4  ;;  %s1202_s24 = int_to_ptr.vmem [resolvable:$false] %s1201_s24 }
  0x1f   : > { %1110 = vmatprep.subr.msk.bf16.mxu0 %vm1360_vm1, %v1108_v4  ;;  %1132 = vmatprep.subr.msk.bf16.mxu1 %vm1360_vm1, %v1108_v4  ;;  %v198_v10 = vsel %vm197_vm0, %v189_v7, 0.0  ;;  %v204_v11 = vsel %vm197_vm0, %v191_v8, 0.0  ;;  %v201_v16 = vsel %vm197_vm0, %v190_v12, 0.0  ;;  %v1120_v19 = vpack.c.bf16 %v176_v14, %v175_v6  ;;  %p1199_p13 = pnand %p1198_p12, %p1333_p4  ;;  %s1203_s25 = scalar_lea.vmem %s1202_s24, 256 }
  0x20   : > { %1113 = vmatpush3.bf16.xpose.msk.msra.mxu0 %vm1360_vm1, %v1108_v4  ;;  %1136 = vmatpush3.bf16.xpose.msk.msra.mxu1 %vm1360_vm1, %v1108_v4  ;;  %v207_v17 = vsel %vm197_vm0, %v192_v13, 0.0  ;;  %v213_v22 = vsel %vm197_vm0, %v194_v18, 0.0  ;;  %v210_v23 = vsel %vm197_vm0, %v193_v15, 0.0  ;;  %v196_v24 = vmul.f32 %v178_v21, %v178_v21  ;;  %p1204_p1 = scmp.lt.s32.totalorder %s1827_s6, %s1202_s24  ;;  %p1205_p2 = scmp.lt.s32.totalorder %s1203_s25, %s1197_s23 }
  0x21   : > { %1116 = vmatprep.subr.msk.bf16.mxu0 %vm1360_vm1, %v1114_v9  ;;  %1133 = vmatprep.subr.msk.bf16.mxu1 %vm1360_vm1, %v1114_v9  ;;  %v195_v25 = vmul.f32 %v177_v20, %v177_v20  ;;  %v1126_v28 = vpack.c.bf16 %v178_v21, %v177_v20  ;;  %p1200_p0 = pneg %p1199_p13 }
  0x22   : > { %199 = vadd.xlane.f32.xlu0 %v198_v10  ;;  %205 = vadd.xlane.f32.xlu1 %v204_v11  ;;  %v219_v26 = vsel %vm197_vm0, %v196_v24, 0.0  ;;  %p1206_p3 = por %p1205_p2, %p1204_p1 }
  0x23   : > { %v216_v27 = vsel %vm197_vm0, %v195_v25, 0.0 }
  0x24   : > { %p1207_p5 = pnand %p1206_p3, %p1200_p0 }
  0x26   : > { %202 = vadd.xlane.f32.xlu0 %v201_v16  ;;  %208 = vadd.xlane.f32.xlu1 %v207_v17  ;;  %v418_v16 = vadd.s32 16, %v1424_v36  ;;  %v421_v17 = vadd.s32 40, %v1424_v36 }
  0x28   : > { %1119 = vmatpush3.bf16.xpose.msk.msra.mxu0 %vm1360_vm1, %v1114_v9  ;;  %1137 = vmatpush3.bf16.xpose.msk.msra.mxu1 %vm1360_vm1, %v1114_v9  ;;  %vm459_vm6 = vcmp.eq.s32.totalorder %v1426_v41, %v418_v16  ;;  %vm462_vm7 = vcmp.eq.s32.totalorder %v1426_v41, %v421_v17 }
  0x29   : > { %1122 = vmatprep.subr.msk.bf16.mxu0 %vm1360_vm1, %v1120_v19  ;;  %1134 = vmatprep.subr.msk.bf16.mxu1 %vm1360_vm1, %v1120_v19 }
  0x2a   : > { %214 = vadd.xlane.f32.xlu1 %v213_v22  ;;  %211 = vadd.xlane.f32.xlu0 %v210_v23  ;;  %v420_v23 = vadd.s32 32, %v1424_v36 }
  0x2c   : > { %vm461_vm8 = vcmp.eq.s32.totalorder %v1426_v41, %v420_v23 }
  0x2e   : > { %220 = vadd.xlane.f32.xlu1 %v219_v26  ;;  %217 = vadd.xlane.f32.xlu0 %v216_v27 }
  0x30   : > { %1125 = vmatpush3.bf16.xpose.msk.msra.mxu0 %vm1360_vm1, %v1120_v19  ;;  %1138 = vmatpush3.bf16.xpose.msk.msra.mxu1 %vm1360_vm1, %v1120_v19 }
  0x31   : > { %1128 = vmatprep.subr.msk.bf16.mxu0 %vm1360_vm1, %v1126_v28  ;;  %1135 = vmatprep.subr.msk.bf16.mxu1 %vm1360_vm1, %v1126_v28 }
  0x38   : > { %1131 = vmatpush3.bf16.xpose.msk.msra.mxu0 %vm1360_vm1, %v1126_v28  ;;  %1139 = vmatpush3.bf16.xpose.msk.msra.mxu1 %vm1360_vm1, %v1126_v28 }
  0x3f   : > { %1097 = vmatmul.mubr.msk.f32.vlgmr.msra.gmra.mrb[0].mxu0 %vm197_vm0, %v172_v2  ;;  %1103 = vmatmul.mubr.msk.f32.vlgmr.msra.gmra.mrb[0].mxu1 %vm197_vm0, %v176_v14  ;;  %v419_v2 = vadd.s32 24, %v1424_v36 }
  0x40   : > { %1099 = vmatprep.mubr.msk.f32.mxu0 %vm197_vm0, %v173_v3  ;;  %1105 = vmatprep.mubr.msk.f32.mxu1 %vm197_vm0, %v177_v20 }
  0x41   : > { %vm460_vm5 = vcmp.eq.s32.totalorder %v1426_v41, %v419_v2 }
  0x43   : > { %1100 = vmatmul.mubr.msk.f32.gmra.mrb[2].mxu0 %vm197_vm0, %v174_v5  ;;  %1106 = vmatmul.mubr.msk.f32.gmra.mrb[2].mxu1 %vm197_vm0, %v178_v21 }
  0xaf   : > { %v206_v29 = vpop.xlane.xlu1 %205  ;;  %v200_v30 = vpop.xlane.xlu0 %199 }
  0xb0   : > { %v381_v49 = vadd.f32 %v1058_v34, %v200_v30  ;;  %v383_v61 = vadd.f32 %v1058_v34, %v206_v29  ;;  %v423_v29 = vadd.s32 56, %v1424_v36 }
  0xb2   : > { %vm464_vm9 = vcmp.eq.s32.totalorder %v1426_v41, %v423_v29 }
  0xb3   : > { %v209_v31 = vpop.xlane.xlu1 %208  ;;  %v203_v33 = vpop.xlane.xlu0 %202 }
  0xb4   : > { %v382_v38 = vadd.f32 %v1058_v34, %v203_v33  ;;  %v384_v53 = vadd.f32 %v1058_v34, %v209_v31  ;;  %v422_v33 = vadd.s32 48, %v1424_v36 }
  0xb6   : > { %vm463_vm10 = vcmp.eq.s32.totalorder %v1426_v41, %v422_v33 }
  0xb7   : > { %v215_v35 = vpop.xlane.xlu1 %214  ;;  %v212_v37 = vpop.xlane.xlu0 %211 }
  0xb8   : > { %v386_v39 = vadd.f32 %v1058_v34, %v215_v35  ;;  %v385_v43 = vadd.f32 %v1058_v34, %v212_v37 }
  0xbb   : > { %v221_v55 = vpop.xlane.xlu1 %220  ;;  %v218_v56 = vpop.xlane.xlu0 %217 }
  0xbc   : > { %v388_v6 = vadd.f32 %v1058_v34, %v221_v55  ;;  %v387_v10 = vadd.f32 %v1058_v34, %v218_v56 }
 0x112   : > { %v1098_v40 = vpop.f32.mrb[0].mxu0  ;;  %v1104_v42 = vpop.f32.mrb[0].mxu1 }
 0x113   : > { %v390_v45 = vmul.f32 2.0, %v1098_v40  ;;  %v336_v46 = vpop.f32.mrb[1].mxu0  ;;  %v394_v47 = vmul.f32 2.0, %v1104_v42  ;;  %v356_v48 = vpop.f32.mrb[1].mxu1 }
 0x114   : > { %v389_v50 = vmul.f32 2.0, %v336_v46  ;;  %v393_v51 = vmul.f32 2.0, %v356_v48 }
 0x115   : > { %v398_v52 = vsub.f32 %v382_v38, %v390_v45  ;;  %v402_v54 = vsub.f32 %v386_v39, %v394_v47 }
 0x116   : > { %v397_v57 = vsub.f32 %v381_v49, %v389_v50  ;;  %v1101_v58 = vpop.f32.mrb[2].mxu0  ;;  %v401_v59 = vsub.f32 %v385_v43, %v393_v51  ;;  %v1107_v60 = vpop.f32.mrb[2].mxu1 }
 0x117   : > { %v1430_v62 = vmax.f32 %v398_v52, 0.0  ;;  %v392_v63 = vmul.f32 2.0, %v1101_v58  ;;  %v346_v0 = vpop.f32.mrb[3].mxu0  ;;  %v366_v1 = vpop.f32.mrb[3].mxu1  ;;  %v1435_v5 = vmax.f32 %v402_v54, 0.0  ;;  %v396_v9 = vmul.f32 2.0, %v1107_v60 }
 0x118   : > { %v1433_v3 = vmax.f32 %v397_v57, 0.0  ;;  %v391_v4 = vmul.f32 2.0, %v346_v0  ;;  %v1439_v13 = vmax.f32 %v401_v59, 0.0  ;;  %v395_v14 = vmul.f32 2.0, %v366_v1 }
 0x119   : > { %v442_v7 = vand.u32 4294967232, %v1430_v62  ;;  %v400_v8 = vsub.f32 %v384_v53, %v392_v63  ;;  %v446_v19 = vand.u32 4294967232, %v1435_v5  ;;  %v404_v26 = vsub.f32 %v388_v6, %v396_v9 }
 0x11a   : > { %v441_v11 = vand.u32 4294967232, %v1433_v3  ;;  %v399_v12 = vsub.f32 %v383_v61, %v391_v4  ;;  %v445_v25 = vand.u32 4294967232, %v1439_v13  ;;  %v403_v27 = vsub.f32 %v387_v10, %v395_v14 }
 0x11b   : > { %v1441_v15 = vmax.f32 %v400_v8, 0.0  ;;  %v450_v20 = vor.u32 %v442_v7, %v1426_v41  ;;  %v454_v30 = vor.u32 %v446_v19, %v1426_v41  ;;  %v1462_v31 = vmax.f32 %v404_v26, 0.0 }
 0x11c   : > { %v1445_v18 = vmax.f32 %v399_v12, 0.0  ;;  %v449_v21 = vor.u32 %v441_v11, %v1426_v41  ;;  %v1464_v32 = vmax.f32 %v403_v27, 0.0  ;;  %v453_v39 = vor.u32 %v445_v25, %v1426_v41 }
 0x11d   : > { %v444_v22 = vand.u32 4294967232, %v1441_v15  ;;  %v1470_v35 = vsel %vm458_vm2, 2147483647, %v450_v20  ;;  %v448_v40 = vand.u32 4294967232, %v1462_v31  ;;  %v1501_v51 = vsel %vm462_vm7, 2147483647, %v454_v30 }
 0x11e   : > { %v443_v24 = vand.u32 4294967232, %v1445_v18  ;;  %v1475_v37 = vsel %vm457_vm4, 2147483647, %v449_v21  ;;  %v447_v42 = vand.u32 4294967232, %v1464_v32  ;;  %v489_v43 = vsel %vm473_vm3, %v1470_v35, 2147483647 }
 0x11f   : > { %v452_v28 = vor.u32 %v444_v22, %v1426_v41  ;;  %v474_v36 = vsel %vm473_vm3, %v1475_v37, 2147483647  ;;  %v456_v45 = vor.u32 %v448_v40, %v1426_v41  ;;  %v491_v47 = vshra.s32 %v489_v43, 16 }
 0x120   : > { %v451_v34 = vor.u32 %v443_v24, %v1426_v41  ;;  %v455_v46 = vor.u32 %v447_v42, %v1426_v41  ;;  %v476_v48 = vshra.s32 %v474_v36, 16  ;;  %v549_v54 = vsel %vm473_vm3, %v1501_v51, 2147483647 }
 0x121   : > { %v1479_v38 = vsel %vm460_vm5, 2147483647, %v452_v28  ;;  %v493_v52 = vcvt.s32.f32 %v491_v47  ;;  %v1509_v55 = vsel %vm461_vm8, 2147483647, %v453_v39  ;;  %v551_v58 = vshra.s32 %v549_v54, 16 }
 0x122   : > { %v519_v44 = vsel %vm473_vm3, %v1479_v38, 2147483647  ;;  %v1497_v50 = vsel %vm459_vm6, 2147483647, %v451_v34  ;;  %1904 = vst [vmem:[#allocation5_spill] sm:$0xff] %v1509_v55  ;;  %v478_v56 = vcvt.s32.f32 %v476_v48  ;;  %v490_v11 = vand.u32 65535, %v489_v43 }
 0x123   : > { %v521_v49 = vshra.s32 %v519_v44, 16  ;;  %v504_v53 = vsel %vm473_vm3, %v1497_v50, 2147483647  ;;  %494 = vmin.xlane.f32.xlu1 %v493_v52  ;;  %v534_v60 = vsel %vm473_vm3, %v1509_v55, 2147483647  ;;  %v553_v6 = vcvt.s32.f32 %v551_v58 }
 0x124   : > { %v506_v57 = vshra.s32 %v504_v53, 16  ;;  %v1515_v61 = vsel %vm464_vm9, 2147483647, %v456_v45  ;;  %v1519_v63 = vsel %vm463_vm10, 2147483647, %v455_v46  ;;  %479 = vmin.xlane.f32.xlu0 %v478_v56  ;;  %v536_v1 = vshra.s32 %v534_v60, 16 }
 0x125   : > { %v523_v59 = vcvt.s32.f32 %v521_v49  ;;  %1905 = vst [vmem:[#allocation6_spill] sm:$0xff] %v1515_v61  ;;  %1906 = vst [vmem:[#allocation7_spill] sm:$0xff] %v1519_v63  ;;  %v579_v2 = vsel %vm473_vm3, %v1515_v61, 2147483647  ;;  %v564_v4 = vsel %vm473_vm3, %v1519_v63, 2147483647  ;;  %v492_v16 = vcvt.s32.f32 %v490_v11 }
 0x126   : > { %v508_v0 = vcvt.s32.f32 %v506_v57  ;;  %v581_v7 = vshra.s32 %v579_v2, 16  ;;  %v538_v8 = vcvt.s32.f32 %v536_v1  ;;  %v566_v9 = vshra.s32 %v564_v4, 16 }
 0x127   : > { %524 = vmin.xlane.f32.xlu1 %v523_v59  ;;  %v475_v12 = vand.u32 65535, %v474_v36  ;;  %v520_v17 = vand.u32 65535, %v519_v44  ;;  %v505_v21 = vand.u32 65535, %v504_v53  ;;  %v550_v26 = vand.u32 65535, %v549_v54 }
 0x128   : > { %509 = vmin.xlane.f32.xlu0 %v508_v0  ;;  %v583_v10 = vcvt.s32.f32 %v581_v7  ;;  %v568_v41 = vcvt.s32.f32 %v566_v9  ;;  %v535_v29 = vand.u32 65535, %v534_v60  ;;  %v580_v40 = vand.u32 65535, %v579_v2 }
 0x129   : > { %v477_v20 = vcvt.s32.f32 %v475_v12  ;;  %v522_v25 = vcvt.s32.f32 %v520_v17  ;;  %v507_v28 = vcvt.s32.f32 %v505_v21  ;;  %v552_v39 = vcvt.s32.f32 %v550_v26 }
 0x12a   : > { %v537_v43 = vcvt.s32.f32 %v535_v29  ;;  %v565_v36 = vand.u32 65535, %v564_v4  ;;  %v582_v47 = vcvt.s32.f32 %v580_v40 }
 0x12b   : > { %554 = vmin.xlane.f32.xlu1 %v553_v6 }
 0x12c   : > { %539 = vmin.xlane.f32.xlu0 %v538_v8  ;;  %v567_v49 = vcvt.s32.f32 %v565_v36 }
 0x12f   : > { %584 = vmin.xlane.f32.xlu1 %v583_v10 }
 0x130   : > { %569 = vmin.xlane.f32.xlu0 %v568_v41 }
 0x1b0   : > { %v495_v14 = vpop.xlane.xlu1 %494 }
 0x1b1   : > { %v480_v19 = vpop.xlane.xlu0 %479  ;;  %vm496_vm11 = vcmp.eq.f32.partialorder %v493_v52, %v495_v14  ;;  %v501_v54 = vcvt.f32.s32 %v495_v14 }
 0x1b2   : > { %v497_v22 = vsel %vm496_vm11, %v492_v16, inf  ;;  %vm481_vm12 = vcmp.eq.f32.partialorder %v478_v56, %v480_v19  ;;  %v486_v56 = vcvt.f32.s32 %v480_v19 }
 0x1b3   : > { %498 = vmin.xlane.f32.xlu1 %v497_v22  ;;  %v482_v23 = vsel %vm481_vm12, %v477_v20, inf  ;;  %v502_v58 = vshll.u32 %v501_v54, 16 }
 0x1b4   : > { %v525_v24 = vpop.xlane.xlu1 %524  ;;  %483 = vmin.xlane.f32.xlu0 %v482_v23  ;;  %v487_v2 = vshll.u32 %v486_v56, 16 }
 0x1b5   : > { %v510_v27 = vpop.xlane.xlu0 %509  ;;  %vm526_vm13 = vcmp.eq.f32.partialorder %v523_v59, %v525_v24  ;;  %v531_v59 = vcvt.f32.s32 %v525_v24 }
 0x1b6   : > { %v527_v30 = vsel %vm526_vm13, %v522_v25, inf  ;;  %vm511_vm14 = vcmp.eq.f32.partialorder %v508_v0, %v510_v27  ;;  %v516_v60 = vcvt.f32.s32 %v510_v27 }
 0x1b7   : > { %528 = vmin.xlane.f32.xlu1 %v527_v30  ;;  %v512_v33 = vsel %vm511_vm14, %v507_v28, inf }
 0x1b8   : > { %v555_v34 = vpop.xlane.xlu1 %554  ;;  %513 = vmin.xlane.f32.xlu0 %v512_v33  ;;  %v517_v11 = vshll.u32 %v516_v60, 16 }
 0x1b9   : > { %v540_v42 = vpop.xlane.xlu0 %539  ;;  %vm556_vm15 = vcmp.eq.f32.partialorder %v553_v6, %v555_v34  ;;  %v561_v4 = vcvt.f32.s32 %v555_v34 }
 0x1ba   : > { %v557_v44 = vsel %vm556_vm15, %v552_v39, inf  ;;  %vm541_vm0 = vcmp.eq.f32.partialorder %v538_v8, %v540_v42  ;;  %v546_v7 = vcvt.f32.s32 %v540_v42 }
 0x1bb   : > { %558 = vmin.xlane.f32.xlu1 %v557_v44  ;;  %v542_v45 = vsel %vm541_vm0, %v537_v43, inf  ;;  %v562_v16 = vshll.u32 %v561_v4, 16 }
 0x1bc   : > { %v585_v46 = vpop.xlane.xlu1 %584  ;;  %543 = vmin.xlane.f32.xlu0 %v542_v45  ;;  %v547_v20 = vshll.u32 %v546_v7, 16 }
 0x1bd   : > { %v570_v48 = vpop.xlane.xlu0 %569  ;;  %vm586_vm1 = vcmp.eq.f32.partialorder %v583_v10, %v585_v46  ;;  %v591_v24 = vcvt.f32.s32 %v585_v46 }
 0x1be   : > { %v587_v52 = vsel %vm586_vm1, %v582_v47, inf  ;;  %vm571_vm2 = vcmp.eq.f32.partialorder %v568_v41, %v570_v48  ;;  %v532_v41 = vshll.u32 %v531_v59, 16  ;;  %v576_v29 = vcvt.f32.s32 %v570_v48 }
 0x1bf   : > { %588 = vmin.xlane.f32.xlu1 %v587_v52  ;;  %v572_v53 = vsel %vm571_vm2, %v567_v49, inf  ;;  %v592_v46 = vshll.u32 %v591_v24, 16 }
 0x1c0   : > { %573 = vmin.xlane.f32.xlu0 %v572_v53  ;;  %v577_v53 = vshll.u32 %v576_v29, 16 }
 0x240   : > { %v499_v57 = vpop.xlane.xlu1 %498 }
 0x241   : > { %v500_v0 = vcvt.f32.s32 %v499_v57  ;;  %v484_v1 = vpop.xlane.xlu0 %483 }
 0x242   : > { %v485_v6 = vcvt.f32.s32 %v484_v1 }
 0x243   : > { %v1525_v8 = vadd.s32 %v502_v58, %v500_v0 }
 0x244   : > { %v1527_v9 = vadd.s32 %v487_v2, %v485_v6  ;;  %v529_v10 = vpop.xlane.xlu1 %528 }
 0x245   : > { %vm595_vm4 = vcmp.eq.s32.totalorder %v1470_v35, %v1525_v8  ;;  %v530_v12 = vcvt.f32.s32 %v529_v10  ;;  %v514_v14 = vpop.xlane.xlu0 %513 }
 0x246   : > { %vm594_vm5 = vcmp.eq.s32.totalorder %v1475_v37, %v1527_v9  ;;  %v515_v17 = vcvt.f32.s32 %v514_v14  ;;  %v1537_v19 = vsel %vm595_vm4, 2147483647, %v1470_v35 }
 0x247   : > { %v1539_v21 = vadd.s32 %v532_v41, %v530_v12  ;;  %v1543_v22 = vsel %vm473_vm3, %v1537_v19, 2147483647  ;;  %v1549_v23 = vsel %vm594_vm5, 2147483647, %v1475_v37 }
 0x248   : > { %v1551_v25 = vadd.s32 %v517_v11, %v515_v17  ;;  %v559_v26 = vpop.xlane.xlu1 %558  ;;  %v627_v27 = vshra.s32 %v1543_v22, 16  ;;  %v1556_v28 = vsel %vm473_vm3, %v1549_v23, 2147483647 }
 0x249   : > { %vm597_vm6 = vcmp.eq.s32.totalorder %v1479_v38, %v1539_v21  ;;  %v560_v30 = vcvt.f32.s32 %v559_v26  ;;  %v544_v33 = vpop.xlane.xlu0 %543  ;;  %v612_v34 = vshra.s32 %v1556_v28, 16 }
 0x24a   : > { %vm596_vm7 = vcmp.eq.s32.totalorder %v1497_v50, %v1551_v25  ;;  %v545_v39 = vcvt.f32.s32 %v544_v33  ;;  %v629_v40 = vcvt.s32.f32 %v627_v27  ;;  %v1567_v42 = vsel %vm597_vm6, 2147483647, %v1479_v38 }
 0x24b   : > { %v1569_v43 = vadd.s32 %v562_v16, %v560_v30  ;;  %v614_v36 = vcvt.s32.f32 %v612_v34  ;;  %v655_v44 = vsel %vm473_vm3, %v1567_v42, 2147483647  ;;  %v1577_v45 = vsel %vm596_vm7, 2147483647, %v1497_v50 }
 0x24c   : > { %v1579_v47 = vadd.s32 %v547_v20, %v545_v39  ;;  %630 = vmin.xlane.f32.xlu1 %v629_v40  ;;  %v589_v48 = vpop.xlane.xlu1 %588  ;;  %v657_v49 = vshra.s32 %v655_v44, 16  ;;  %v640_v52 = vsel %vm473_vm3, %v1577_v45, 2147483647  ;;  %v626_v30 = vand.u32 65535, %v1543_v22 }
 0x24d   : > { %vm599_vm8 = vcmp.eq.s32.totalorder %v1501_v51, %v1569_v43  ;;  %v590_v54 = vcvt.f32.s32 %v589_v48  ;;  %615 = vmin.xlane.f32.xlu0 %v614_v36  ;;  %v574_v56 = vpop.xlane.xlu0 %573  ;;  %v642_v57 = vshra.s32 %v640_v52, 16  ;;  %v611_v33 = vand.u32 65535, %v1556_v28 }
 0x24e   : > { %1907 = vst [vmem:[#allocation8_spill] sm:$0xff] %v1579_v47  ;;  %vm1899_vm9 = vcmp.eq.s32.totalorder %v1509_v55, %v1579_v47  ;;  %v575_v58 = vcvt.f32.s32 %v574_v56  ;;  %v659_v59 = vcvt.s32.f32 %v657_v49  ;;  %v1591_v60 = vsel %vm599_vm8, 2147483647, %v1501_v51 }
 0x24f   : > { %v1593_v0 = vadd.s32 %v592_v46, %v590_v54  ;;  %v644_v1 = vcvt.s32.f32 %v642_v57  ;;  %v685_v2 = vsel %vm473_vm3, %v1591_v60, 2147483647  ;;  %v1601_v4 = vsel %vm1899_vm9, 2147483647, %v1509_v55 }
 0x250   : > { %v1603_v6 = vadd.s32 %v577_v53, %v575_v58  ;;  %660 = vmin.xlane.f32.xlu1 %v659_v59  ;;  %v687_v7 = vshra.s32 %v685_v2, 16  ;;  %v670_v10 = vsel %vm473_vm3, %v1601_v4, 2147483647  ;;  %v628_v39 = vcvt.s32.f32 %v626_v30 }
 0x251   : > { %1908 = vst [vmem:[#allocation9_spill] sm:$0xff] %v1593_v0  ;;  %vm1893_vm10 = vcmp.eq.s32.totalorder %v1515_v61, %v1593_v0  ;;  %645 = vmin.xlane.f32.xlu0 %v644_v1  ;;  %v672_v41 = vshra.s32 %v670_v10, 16  ;;  %v656_v46 = vand.u32 65535, %v655_v44  ;;  %v613_v49 = vcvt.s32.f32 %v611_v33 }
 0x252   : > { %1909 = vst [vmem:[#allocation10_spill] sm:$0xff] %v1603_v6  ;;  %vm1880_vm11 = vcmp.eq.s32.totalorder %v1519_v63, %v1603_v6  ;;  %v689_v11 = vcvt.s32.f32 %v687_v7  ;;  %v1615_v12 = vsel %vm1893_vm10, 2147483647, %v1515_v61  ;;  %v641_v53 = vand.u32 65535, %v640_v52 }
 0x253   : > { %1910 = vst [vmem:[#allocation11_spill] sm:$0xff] %v1615_v12  ;;  %v674_v14 = vcvt.s32.f32 %v672_v41  ;;  %v715_v16 = vsel %vm473_vm3, %v1615_v12, 2147483647  ;;  %v1623_v17 = vsel %vm1880_vm11, 2147483647, %v1519_v63  ;;  %v658_v58 = vcvt.s32.f32 %v656_v46 }
 0x254   : > { %1911 = vst [vmem:[#allocation12_spill] sm:$0xff] %v1623_v17  ;;  %690 = vmin.xlane.f32.xlu1 %v689_v11  ;;  %v717_v20 = vshra.s32 %v715_v16, 16  ;;  %v700_v24 = vsel %vm473_vm3, %v1623_v17, 2147483647  ;;  %v686_v7 = vand.u32 65535, %v685_v2  ;;  %v643_v22 = vcvt.s32.f32 %v641_v53 }
 0x255   : > { %675 = vmin.xlane.f32.xlu0 %v674_v14  ;;  %v702_v26 = vshra.s32 %v700_v24, 16  ;;  %v716_v52 = vand.u32 65535, %v715_v16  ;;  %v701_v33 = vand.u32 65535, %v700_v24 }
 0x256   : > { %v719_v27 = vcvt.s32.f32 %v717_v20  ;;  %v671_v20 = vand.u32 65535, %v670_v10 }
 0x257   : > { %v704_v29 = vcvt.s32.f32 %v702_v26 }
 0x258   : > { %720 = vmin.xlane.f32.xlu1 %v719_v27 }
 0x259   : > { %705 = vmin.xlane.f32.xlu0 %v704_v29 }
 0x2d9   : > { %v631_v34 = vpop.xlane.xlu1 %630 }
 0x2da   : > { %v616_v48 = vpop.xlane.xlu0 %615  ;;  %vm632_vm12 = vcmp.eq.f32.partialorder %v629_v40, %v631_v34  ;;  %v688_v40 = vcvt.s32.f32 %v686_v7  ;;  %v637_v16 = vcvt.f32.s32 %v631_v34 }
 0x2db   : > { %v633_v54 = vsel %vm632_vm12, %v628_v39, inf  ;;  %vm617_vm13 = vcmp.eq.f32.partialorder %v614_v36, %v616_v48  ;;  %v673_v36 = vcvt.s32.f32 %v671_v20 }
 0x2dc   : > { %634 = vmin.xlane.f32.xlu1 %v633_v54  ;;  %v618_v56 = vsel %vm617_vm13, %v613_v49, inf  ;;  %v622_v54 = vcvt.f32.s32 %v616_v48 }
 0x2dd   : > { %v661_v57 = vpop.xlane.xlu1 %660  ;;  %619 = vmin.xlane.f32.xlu0 %v618_v56  ;;  %v638_v56 = vshll.u32 %v637_v16, 16 }
 0x2de   : > { %v646_v41 = vpop.xlane.xlu0 %645  ;;  %vm662_vm14 = vcmp.eq.f32.partialorder %v659_v59, %v661_v57  ;;  %v718_v59 = vcvt.s32.f32 %v716_v52  ;;  %v667_v24 = vcvt.f32.s32 %v661_v57 }
 0x2df   : > { %v663_v28 = vsel %vm662_vm14, %v658_v58, inf  ;;  %vm647_vm15 = vcmp.eq.f32.partialorder %v644_v1, %v646_v41  ;;  %v703_v1 = vcvt.s32.f32 %v701_v33  ;;  %v652_v58 = vcvt.f32.s32 %v646_v41 }
 0x2e0   : > { %664 = vmin.xlane.f32.xlu1 %v663_v28  ;;  %v648_v44 = vsel %vm647_vm15, %v643_v22, inf  ;;  %v623_v22 = vshll.u32 %v622_v54, 16  ;;  %v668_v52 = vshll.u32 %v667_v24, 16 }
 0x2e1   : > { %v691_v26 = vpop.xlane.xlu1 %690  ;;  %649 = vmin.xlane.f32.xlu0 %v648_v44 }
 0x2e2   : > { %v676_v30 = vpop.xlane.xlu0 %675  ;;  %vm692_vm0 = vcmp.eq.f32.partialorder %v689_v11, %v691_v26  ;;  %v697_v20 = vcvt.f32.s32 %v691_v26 }
 0x2e3   : > { %v693_v39 = vsel %vm692_vm0, %v688_v40, inf  ;;  %vm677_vm1 = vcmp.eq.f32.partialorder %v674_v14, %v676_v30  ;;  %v682_v44 = vcvt.f32.s32 %v676_v30 }
 0x2e4   : > { %694 = vmin.xlane.f32.xlu1 %v693_v39  ;;  %v678_v2 = vsel %vm677_vm1, %v673_v36, inf  ;;  %v653_v36 = vshll.u32 %v652_v58, 16  ;;  %v698_v57 = vshll.u32 %v697_v20, 16 }
 0x2e5   : > { %v721_v46 = vpop.xlane.xlu1 %720  ;;  %679 = vmin.xlane.f32.xlu0 %v678_v2  ;;  %v683_v30 = vshll.u32 %v682_v44, 16 }
 0x2e6   : > { %v706_v10 = vpop.xlane.xlu0 %705  ;;  %vm722_vm2 = vcmp.eq.f32.partialorder %v719_v27, %v721_v46 }
 0x2e7   : > { %v723_v49 = vsel %vm722_vm2, %v718_v59, inf  ;;  %vm707_vm12 = vcmp.eq.f32.partialorder %v704_v29, %v706_v10  ;;  %v727_v59 = vcvt.f32.s32 %v721_v46  ;;  %v712_v54 = vcvt.f32.s32 %v706_v10 }
 0x2e8   : > { %724 = vmin.xlane.f32.xlu1 %v723_v49  ;;  %v708_v53 = vsel %vm707_vm12, %v703_v1, inf }
 0x2e9   : > { %709 = vmin.xlane.f32.xlu0 %v708_v53 }
 0x369   : > { %v635_v11 = vpop.xlane.xlu1 %634 }
 0x36a   : > { %v636_v14 = vcvt.f32.s32 %v635_v11  ;;  %v620_v7 = vpop.xlane.xlu0 %619 }
 0x36b   : > { %v621_v28 = vcvt.f32.s32 %v620_v7 }
 0x36c   : > { %v1629_v40 = vadd.s32 %v638_v56, %v636_v14 }
 0x36d   : > { %v1631_v27 = vadd.s32 %v623_v22, %v621_v28  ;;  %v665_v29 = vpop.xlane.xlu1 %664  ;;  %v728_v28 = vshll.u32 %v727_v59, 16 }
 0x36e   : > { %vm731_vm13 = vcmp.eq.s32.totalorder %v1537_v19, %v1629_v40  ;;  %v666_v34 = vcvt.f32.s32 %v665_v29  ;;  %v650_v48 = vpop.xlane.xlu0 %649 }
 0x36f   : > { %vm730_vm14 = vcmp.eq.s32.totalorder %v1549_v23, %v1631_v27  ;;  %v651_v41 = vcvt.f32.s32 %v650_v48  ;;  %v1641_v26 = vsel %vm731_vm13, 2147483647, %v1537_v19 }
 0x370   : > { %v1643_v33 = vadd.s32 %v668_v52, %v666_v34  ;;  %v1647_v39 = vsel %vm473_vm3, %v1641_v26, 2147483647  ;;  %v1653_v2 = vsel %vm730_vm14, 2147483647, %v1549_v23  ;;  %v713_v34 = vshll.u32 %v712_v54, 16 }
 0x371   : > { %v1655_v1 = vadd.s32 %v653_v36, %v651_v41  ;;  %v695_v49 = vpop.xlane.xlu1 %694  ;;  %v771_v53 = vshra.s32 %v1647_v39, 16  ;;  %v1660_v16 = vsel %vm473_vm3, %v1653_v2, 2147483647 }
 0x372   : > { %vm733_vm15 = vcmp.eq.s32.totalorder %v1567_v42, %v1643_v33  ;;  %v696_v11 = vcvt.f32.s32 %v695_v49  ;;  %v680_v56 = vpop.xlane.xlu0 %679  ;;  %v756_v24 = vshra.s32 %v1660_v16, 16 }
 0x373   : > { %vm732_vm0 = vcmp.eq.s32.totalorder %v1577_v45, %v1655_v1  ;;  %v681_v46 = vcvt.f32.s32 %v680_v56  ;;  %v773_v58 = vcvt.s32.f32 %v771_v53  ;;  %v1671_v14 = vsel %vm733_vm15, 2147483647, %v1567_v42 }
 0x374   : > { %v1673_v7 = vadd.s32 %v698_v57, %v696_v11  ;;  %v758_v10 = vcvt.s32.f32 %v756_v24  ;;  %v799_v22 = vsel %vm473_vm3, %v1671_v14, 2147483647  ;;  %v1681_v20 = vsel %vm732_vm0, 2147483647, %v1577_v45 }
 0x375   : > { %v1683_v44 = vadd.s32 %v683_v30, %v681_v46  ;;  %774 = vmin.xlane.f32.xlu1 %v773_v58  ;;  %v725_v29 = vpop.xlane.xlu1 %724  ;;  %v801_v52 = vshra.s32 %v799_v22, 16  ;;  %v784_v36 = vsel %vm473_vm3, %v1681_v20, 2147483647 }
 0x376   : > { %vm735_vm1 = vcmp.eq.s32.totalorder %v1591_v60, %v1673_v7  ;;  %v726_v48 = vcvt.f32.s32 %v725_v29  ;;  %759 = vmin.xlane.f32.xlu0 %v758_v10  ;;  %v710_v57 = vpop.xlane.xlu0 %709  ;;  %v786_v41 = vshra.s32 %v784_v36, 16 }
 0x377   : > { %1912 = vst [vmem:[#allocation13_spill] sm:$0xff] %v1683_v44  ;;  %vm734_vm2 = vcmp.eq.s32.totalorder %v1601_v4, %v1683_v44  ;;  %v711_v59 = vcvt.f32.s32 %v710_v57  ;;  %v803_v30 = vcvt.s32.f32 %v801_v52  ;;  %v1695_v49 = vsel %vm735_vm1, 2147483647, %v1591_v60 }
 0x378   : > { %1913 = vst [vmem:[#allocation14_spill] sm:$0xff] %v1695_v49  ;;  %v1697_v53 = vadd.s32 %v728_v28, %v726_v48  ;;  %v788_v54 = vcvt.s32.f32 %v786_v41  ;;  %v829_v11 = vsel %vm473_vm3, %v1695_v49, 2147483647  ;;  %v1705_v56 = vsel %vm734_vm2, 2147483647, %v1601_v4 }
 0x379   : > { %1915 = vst [vmem:[#allocation16_spill] sm:$0xff] %v1705_v56  ;;  %v1707_v24 = vadd.s32 %v713_v34, %v711_v59  ;;  %804 = vmin.xlane.f32.xlu1 %v803_v30  ;;  %v831_v46 = vshra.s32 %v829_v11, 16  ;;  %v814_v29 = vsel %vm473_vm3, %v1705_v56, 2147483647  ;;  %v785_v56 = vand.u32 65535, %v784_v36 }
 0x37a   : > { %1914 = vst [vmem:[#allocation15_spill] sm:$0xff] %v1697_v53  ;;  %vm1897_vm12 = vcmp.eq.s32.totalorder %v1615_v12, %v1697_v53  ;;  %789 = vmin.xlane.f32.xlu0 %v788_v54  ;;  %v816_v28 = vshra.s32 %v814_v29, 16  ;;  %v815_v44 = vand.u32 65535, %v814_v29 }
 0x37b   : > { %1916 = vst [vmem:[#allocation17_spill] sm:$0xff] %v1707_v24  ;;  %vm1889_vm11 = vcmp.eq.s32.totalorder %v1623_v17, %v1707_v24  ;;  %v833_v52 = vcvt.s32.f32 %v831_v46  ;;  %v1719_v34 = vsel %vm1897_vm12, 2147483647, %v1615_v12  ;;  %v800_v24 = vand.u32 65535, %v799_v22 }
 0x37c   : > { %1917 = vst [vmem:[#allocation18_spill] sm:$0xff] %v1719_v34  ;;  %v818_v48 = vcvt.s32.f32 %v816_v28  ;;  %v859_v57 = vsel %vm473_vm3, %v1719_v34, 2147483647  ;;  %v1727_v41 = vsel %vm1889_vm11, 2147483647, %v1623_v17  ;;  %v770_v28 = vand.u32 65535, %v1647_v39 }
 0x37d   : > { %1918 = vst [vmem:[#allocation19_spill] sm:$0xff] %v1727_v41  ;;  %834 = vmin.xlane.f32.xlu1 %v833_v52  ;;  %v861_v59 = vshra.s32 %v859_v57, 16  ;;  %v844_v46 = vsel %vm473_vm3, %v1727_v41, 2147483647  ;;  %v755_v34 = vand.u32 65535, %v1660_v16  ;;  %v787_v39 = vcvt.s32.f32 %v785_v56 }
 0x37e   : > { %819 = vmin.xlane.f32.xlu0 %v818_v48  ;;  %v846_v6 = vshra.s32 %v844_v46, 16  ;;  %v772_v53 = vcvt.s32.f32 %v770_v28  ;;  %v860_v36 = vand.u32 65535, %v859_v57  ;;  %v890_v57 = vsub.f32 0.0005, %v1433_v3 }
 0x37f   : > { %v863_v63 = vcvt.s32.f32 %v861_v59  ;;  %v757_v12 = vcvt.s32.f32 %v755_v34  ;;  %v830_v59 = vand.u32 65535, %v829_v11 }
 0x380   : > { %v848_v0 = vcvt.s32.f32 %v846_v6  ;;  %v802_v6 = vcvt.s32.f32 %v800_v24 }
 0x381   : > { %864 = vmin.xlane.f32.xlu1 %v863_v63 }
 0x382   : > { %849 = vmin.xlane.f32.xlu0 %v848_v0 }
 0x402   : > { %v775_v61 = vpop.xlane.xlu1 %774 }
 0x403   : > { %v760_v17 = vpop.xlane.xlu0 %759  ;;  %vm776_vm11 = vcmp.eq.f32.partialorder %v773_v58, %v775_v61  ;;  %v832_v58 = vcvt.s32.f32 %v830_v59 }
 0x404   : > { %v777_v49 = vsel %vm776_vm11, %v772_v53, inf  ;;  %vm761_vm10 = vcmp.eq.f32.partialorder %v758_v10, %v760_v17  ;;  %v817_v10 = vcvt.s32.f32 %v815_v44  ;;  %v781_v44 = vcvt.f32.s32 %v775_v61 }
 0x405   : > { %778 = vmin.xlane.f32.xlu1 %v777_v49  ;;  %v762_v41 = vsel %vm761_vm10, %v757_v12, inf  ;;  %v845_v12 = vand.u32 65535, %v844_v46  ;;  %v766_v34 = vcvt.f32.s32 %v760_v17 }
 0x406   : > { %v805_v47 = vpop.xlane.xlu1 %804  ;;  %763 = vmin.xlane.f32.xlu0 %v762_v41  ;;  %v782_v46 = vshll.u32 %v781_v44, 16  ;;  %v1923_v44 = vld [vmem:[#allocation8_spill] sm:$0xff] }
 0x407   : > { %v790_v55 = vpop.xlane.xlu0 %789  ;;  %vm806_vm12 = vcmp.eq.f32.partialorder %v803_v30, %v805_v47  ;;  %v862_v30 = vcvt.s32.f32 %v860_v36  ;;  %v895_v36 = vsub.f32 0.0005, %v1435_v5 }
 0x408   : > { %v807_v16 = vsel %vm806_vm12, %v802_v6, inf  ;;  %vm791_vm9 = vcmp.eq.f32.partialorder %v788_v54, %v790_v55  ;;  %v847_v54 = vcvt.s32.f32 %v845_v12  ;;  %v811_v6 = vcvt.f32.s32 %v805_v47 }
 0x409   : > { %808 = vmin.xlane.f32.xlu1 %v807_v16  ;;  %v792_v22 = vsel %vm791_vm9, %v787_v39, inf  ;;  %v767_v16 = vshll.u32 %v766_v34, 16  ;;  %v903_v50 = vmax.f32 %v895_v36, 0.0  ;;  %v1925_v34 = vld [vmem:[#allocation14_spill] sm:$0xff]  ;;  %v1935_v36 = vld [vmem:[#allocation12_spill] sm:$0xff] }
 0x40a   : > { %v835_v28 = vpop.xlane.xlu1 %834  ;;  %793 = vmin.xlane.f32.xlu0 %v792_v22  ;;  %v796_v22 = vcvt.f32.s32 %v790_v55  ;;  %v894_v55 = vsub.f32 0.0005, %v1439_v13  ;;  %v812_v5 = vshll.u32 %v811_v6, 16 }
 0x40b   : > { %v820_v53 = vpop.xlane.xlu0 %819  ;;  %vm836_vm11 = vcmp.eq.f32.partialorder %v833_v52, %v835_v28  ;;  %v841_v61 = vcvt.f32.s32 %v835_v28 }
 0x40c   : > { %v837_v49 = vsel %vm836_vm11, %v832_v58, inf  ;;  %vm821_vm10 = vcmp.eq.f32.partialorder %v818_v48, %v820_v53  ;;  %v891_v48 = vsub.f32 0.0005, %v1430_v62  ;;  %v898_v62 = vmax.f32 %v890_v57, 0.0  ;;  %vm739_vm11 = vmor %vm595_vm4, %vm731_vm13  ;;  %v1928_v57 = vld [vmem:[#allocation16_spill] sm:$0xff] }
 0x40d   : > { %838 = vmin.xlane.f32.xlu1 %v837_v49  ;;  %v822_v11 = vsel %vm821_vm10, %v817_v10, inf  ;;  %v826_v3 = vcvt.f32.s32 %v820_v53  ;;  %vm738_vm10 = vmor %vm594_vm5, %vm730_vm14  ;;  %v797_v35 = vshll.u32 %v796_v22, 16  ;;  %v842_v13 = vshll.u32 %v841_v61, 16  ;;  %v1932_v22 = vld [vmem:[#allocation6_spill] sm:$0xff]  ;;  %v1936_v61 = vld [vmem:[#allocation17_spill] sm:$0xff] }
 0x40e   : > { %v1733_v24 = vpop.xlane.xlu1 %864  ;;  %823 = vmin.xlane.f32.xlu0 %v822_v11  ;;  %v899_v10 = vmax.f32 %v891_v48, 0.0  ;;  %vm741_vm5 = vmor %vm597_vm6, %vm733_vm15  ;;  %v902_v25 = vmax.f32 %v894_v55, 0.0  ;;  %v1942_v55 = vld [vmem:[#allocation19_spill] sm:$0xff] }
 0x40f   : > { %v1735_v56 = vpop.xlane.xlu0 %849  ;;  %vm866_vm9 = vcmp.eq.f32.partialorder %v863_v63, %v1733_v24  ;;  %v893_v63 = vsub.f32 0.0005, %v1441_v15  ;;  %v827_v37 = vshll.u32 %v826_v3, 16  ;;  %vm740_vm14 = vmor %vm596_vm7, %vm732_vm0  ;;  %v1941_v3 = vld [vmem:[#allocation18_spill] sm:$0xff] }
 0x410   : > { %v867_v29 = vsel %vm866_vm9, %v862_v30, inf  ;;  %vm851_vm12 = vcmp.eq.f32.partialorder %v848_v0, %v1735_v56  ;;  %v892_v0 = vsub.f32 0.0005, %v1445_v18  ;;  %v856_v33 = vcvt.f32.s32 %v1735_v56  ;;  %vm743_vm0 = vmor %vm599_vm8, %vm735_vm1 }
 0x411   : > { %868 = vmin.xlane.f32.xlu1 %v867_v29  ;;  %v852_v52 = vsel %vm851_vm12, %v847_v54, inf  ;;  %v901_v40 = vmax.f32 %v893_v63, 0.0  ;;  %v896_v30 = vsub.f32 0.0005, %v1464_v32  ;;  %v1929_v63 = vld [vmem:[#allocation11_spill] sm:$0xff] }
 0x412   : > { %853 = vmin.xlane.f32.xlu0 %v852_v52  ;;  %v900_v28 = vmax.f32 %v892_v0, 0.0  ;;  %v1922_v52 = vld [vmem:[#allocation5_spill] sm:$0xff]  ;;  %v857_v48 = vshll.u32 %v856_v33, 16 }
 0x492   : > { %v779_v41 = vpop.xlane.xlu1 %778 }
 0x493   : > { %v780_v59 = vcvt.f32.s32 %v779_v41  ;;  %v764_v39 = vpop.xlane.xlu0 %763 }
 0x494   : > { %v765_v58 = vcvt.f32.s32 %v764_v39 }
 0x495   : > { %v783_v17 = vadd.s32 %v782_v46, %v780_v59 }
 0x496   : > { %v768_v15 = vadd.s32 %v767_v16, %v765_v58  ;;  %v809_v47 = vpop.xlane.xlu1 %808  ;;  %v1930_v16 = vld [vmem:[#allocation15_spill] sm:$0xff]  ;;  %v1933_v58 = vld [vmem:[#allocation9_spill] sm:$0xff] }
 0x497   : > { %vm875_vm9 = vcmp.eq.s32.totalorder %v1641_v26, %v783_v17  ;;  %v810_v18 = vcvt.f32.s32 %v809_v47  ;;  %v794_v19 = vpop.xlane.xlu0 %793  ;;  %v1938_v17 = vld [vmem:[#allocation7_spill] sm:$0xff]  ;;  %v904_v47 = vmax.f32 %v896_v30, 0.0 }
 0x498   : > { %vm883_vm4 = vmor %vm739_vm11, %vm875_vm9  ;;  %vm874_vm13 = vcmp.eq.s32.totalorder %v1653_v2, %v768_v15  ;;  %v795_v8 = vcvt.f32.s32 %v794_v19  ;;  %v871_v2 = vcvt.f32.s32 %v1733_v24 }
 0x499   : > { %v907_v53 = vsel %vm883_vm4, %v899_v10, 0.0  ;;  %vm882_vm12 = vmor %vm738_vm10, %vm874_vm13  ;;  %v813_v23 = vadd.s32 %v812_v5, %v810_v18  ;;  %vm1924_vm10 = vcmp.eq.s32.totalorder %v1922_v52, %v1923_v44  ;;  %vm1931_vm13 = vcmp.eq.s32.totalorder %v1929_v63, %v1930_v16  ;;  %v1939_v10 = vld [vmem:[#allocation10_spill] sm:$0xff] }
 0x49a   : > { %v915_v9 = vsel %vm473_vm3, %v907_v53, 0.0  ;;  %v906_v27 = vsel %vm882_vm12, %v898_v62, 0.0  ;;  %v798_v26 = vadd.s32 %v797_v35, %v795_v8  ;;  %v839_v12 = vpop.xlane.xlu1 %838  ;;  %vm742_vm9 = vmor %vm1924_vm10, %vm734_vm2  ;;  %vm1934_vm12 = vcmp.eq.s32.totalorder %v1932_v22, %v1933_v58 }
 0x49b   : > { %v914_v42 = vsel %vm473_vm3, %v906_v27, 0.0  ;;  %vm877_vm11 = vcmp.eq.s32.totalorder %v1671_v14, %v813_v23  ;;  %v840_v38 = vcvt.f32.s32 %v839_v12  ;;  %v824_v21 = vpop.xlane.xlu0 %823  ;;  %v897_v14 = vsub.f32 0.0005, %v1462_v31 }
 0x49c   : > { %v916_v49 = vadd.f32 %v915_v9, %v914_v42  ;;  %vm1776_vm6 = vmor %vm741_vm5, %vm877_vm11  ;;  %vm876_vm15 = vcmp.eq.s32.totalorder %v1681_v20, %v798_v26  ;;  %v825_v45 = vcvt.f32.s32 %v824_v21  ;;  %v872_v31 = vshll.u32 %v871_v2, 16 }
 0x49d   : > { %v909_v1 = vsel %vm1776_vm6, %v901_v40, 0.0  ;;  %vm884_vm7 = vmor %vm740_vm14, %vm876_vm15  ;;  %v843_v24 = vadd.s32 %v842_v13, %v840_v38  ;;  %vm1937_vm14 = vcmp.eq.s32.totalorder %v1935_v36, %v1936_v61  ;;  %vm1940_vm11 = vcmp.eq.s32.totalorder %v1938_v17, %v1939_v10 }
 0x49e   : > { %v908_v20 = vsel %vm884_vm7, %v900_v28, 0.0  ;;  %v828_v56 = vadd.s32 %v827_v37, %v825_v45  ;;  %v869_v54 = vpop.xlane.xlu1 %868  ;;  %v919_v41 = vsel %vm473_vm3, %v909_v1, 0.0  ;;  %vm745_vm5 = vmor %vm1934_vm12, %vm1931_vm13  ;;  %v905_v15 = vmax.f32 %v897_v14, 0.0 }
 0x49f   : > { %v917_v32 = vsel %vm473_vm3, %v908_v20, 0.0  ;;  %vm879_vm4 = vcmp.eq.s32.totalorder %v1925_v34, %v843_v24  ;;  %v870_v60 = vcvt.f32.s32 %v869_v54  ;;  %v854_v7 = vpop.xlane.xlu0 %853  ;;  %vm744_vm6 = vmor %vm1940_vm11, %vm1937_vm14 }
 0x4a0   : > { %v918_v51 = vadd.f32 %v917_v32, %v916_v49  ;;  %vm1799_vm8 = vmor %vm743_vm0, %vm879_vm4  ;;  %vm878_vm1 = vcmp.eq.s32.totalorder %v1928_v57, %v828_v56  ;;  %v855_v4 = vcvt.f32.s32 %v854_v7 }
 0x4a1   : > { %v911_v46 = vsel %vm1799_vm8, %v903_v50, 0.0  ;;  %vm886_vm2 = vmor %vm742_vm9, %vm878_vm1  ;;  %v873_v6 = vadd.s32 %v872_v31, %v870_v60 }
 0x4a2   : > { %v910_v59 = vsel %vm886_vm2, %v902_v25, 0.0  ;;  %v858_v39 = vadd.s32 %v857_v48, %v855_v4  ;;  %v920_v0 = vadd.f32 %v919_v41, %v918_v51  ;;  %v923_v19 = vsel %vm473_vm3, %v911_v46, 0.0 }
 0x4a3   : > { %v921_v62 = vsel %vm473_vm3, %v910_v59, 0.0  ;;  %vm881_vm15 = vcmp.eq.s32.totalorder %v1941_v3, %v873_v6 }
 0x4a4   : > { %vm880_vm7 = vcmp.eq.s32.totalorder %v1942_v55, %v858_v39  ;;  %vm889_vm0 = vmor %vm745_vm5, %vm881_vm15  ;;  %v922_v5 = vadd.f32 %v921_v62, %v920_v0 }
 0x4a5   : > { %vm888_vm10 = vmor %vm744_vm6, %vm880_vm7  ;;  %v913_v18 = vsel %vm889_vm0, %v905_v15, 0.0 }
 0x4a6   : > { %v912_v40 = vsel %vm888_vm10, %v904_v47, 0.0  ;;  %v924_v35 = vadd.f32 %v923_v19, %v922_v5  ;;  %v927_v13 = vsel %vm473_vm3, %v913_v18, 0.0 }
 0x4a7   : > { %v925_v8 = vsel %vm473_vm3, %v912_v40, 0.0 }
 0x4a8   : > { %v926_v28 = vadd.f32 %v925_v8, %v924_v35 }
 0x4aa   : > { %v928_v53 = vadd.f32 %v927_v13, %v926_v28 }
 0x4ac   : > { %929 = vadd.xlane.f32.xlu0 %v928_v53 }
 0x539   : > { %v930_v23 = vpop.xlane.xlu0 %929 }
 0x53a   : > { %v931_v37 = vrot.slane %v930_v23, 4 }
 0x53c   : > { %v932_v9 = vadd.f32 %v931_v37, %v930_v23 }
 0x53e   : > { %v933_v27 = vrot.slane %v932_v9, 2 }
 0x540   : > { %v934_v26 = vadd.f32 %v933_v27, %v932_v9 }
 0x542   : > { %v935_v12 = vrot.slane %v934_v26, 1 }
 0x544   : > { %v936_v2 = vadd.f32 %v935_v12, %v934_v26 }
 0x546   : > { %1140 = vpush %v936_v2 }
 0x577   : > { %s1141_s8 = spop %1140 }
 0x578   : > { %v938_v42 = vstv %s1141_s8 }
 0x579   : > { %939 = vst [vmem:[%s161_s5] sm:$0xff] %v938_v42 }
 0x57a   : > { %1210 = shalt.err (!%p1207_p5)
}
 0x57b   : > { %s1211_s26 = scalar_lea.hbm %s1832_s18, 128  ;;  %s1215_s29 = scalar_lea.hbm %s1879_s2, 256 }
 0x57c   : > { %p1212_p6 = scmp.ne.s32.totalorder %s1832_s18, %s1211_s26  ;;  %p1216_p10 = scmp.lt.u32.totalorder %s1832_s18, %s1879_s2 }
 0x57d   : > { %p1217_p11 = scmp.lt.u32.totalorder %s1215_s29, %s1211_s26  ;;  %p1219_p13 = scmp.lt.u32.totalorder %s1211_s26, %s1832_s18 }
 0x57e   : > { %p1213_p7 = pnand %p1212_p6, %p1333_p4 }
 0x57f   : > { %p1218_p12 = por %p1217_p11, %p1216_p10 }
 0x580   : > { %p1214_p9 = pneg %p1213_p7 }
 0x581   : > { %p1220_p0 = por %p1219_p13, %p1218_p12 }
 0x583   : > { %p1221_p1 = pnand %p1220_p0, %p1214_p9 }
 0x585   : > { %1224 = shalt.err (!%p1221_p1)
}
 0x586   : > { %1142 = dma.vmem_to_hbm [thread:$0]  (%p1333_p4), %s1827_s6, 128, %s1832_s18, %s941_s20  }
 0x587 PF: > { %p1148_p2 = scmp.ge.s32.totalorder %s1275_s14, 2  ;;  %s967_s4 = sand.u32 1, %s1255_s9  }
 0x588   : > { %s968_s5 = scalar_lea.sflag [#allocation3], %s967_s4 }
 0x589   : > { %p1145_p3 = pnand %p1148_p2, %p1340_p8 }
 0x58b   : > { %1250 = dma.done.wait (!%p1145_p3), %s968_s5, 128  }
 0x58c   : > { %1252 = vsyncadd (!%p1145_p3), %s968_s5, 4294967168  ;;  %s15_s14 = sadd.s32 1, %s1275_s14   ;;  %s1943_s9 = smov %s1259_s10 }
 0x58d   : > { %p12_p5 = scmp.ge.s32.totalorder %s15_s14, 4   ;;  %s1944_s10 = smov %s1263_s11 }
 0x58e   : > { %s1945_s11 = smov %s1346_s22  ;;  %s1946_s12 = smov %s1271_s13 }
 0x58f   : > { %s1947_s13 = smov %s1949_s17  ;;  %14 = sbr.rel (!%p12_p5) target bundleno = 4 (0x4), region = 67 }
 0x596   :  { %973 = vsyncpa [#allocation3], 1 }
 0x597   :  { %975 = vsyncpa [#allocation3 + $0x1], 1 }

</bundles_post_ra>
